<compile_context>
chip_gen: v7x
topology: tpu7x:2x2x1
jax: 0.10.0
libtpu: 0.0.40
codegen_flags: <defaults>
</compile_context>

<pallas_src>
import functools

import jax
import jax.numpy as jnp
from jax import lax
from jax.experimental import pallas as pl
from jax.experimental.pallas import tpu as pltpu


# ---------------------------------------------------------------------------
# Helpers
# ---------------------------------------------------------------------------
def _round_up(x: int, m: int) -> int:
    return ((x + m - 1) // m) * m


def _pick_tile(total: int, max_tile: int, align: int) -> int:
    """Largest tile <= max_tile that divides `total` and is `align`-aligned.

    Falls back to the full dimension (always a legal block) if none exists.
    """
    if total <= max_tile:
        return total
    for t in range(max_tile, align - 1, -1):
        if total % t == 0 and t % align == 0:
            return t
    return total


@functools.lru_cache(maxsize=None)
def _vmem_limit_bytes():
    """Scoped-VMEM limit with headroom for Mosaic internal scratch."""
    try:
        cap = int(pltpu.get_tpu_info().vmem_capacity_bytes)
    except Exception:
        return None
    # 3/4 of physical, but never closer than 24 MiB to the physical capacity.
    return max(32 * 1024 * 1024, min((cap * 3) // 4, cap - 24 * 1024 * 1024))


def _compiler_params(dimension_semantics):
    return pltpu.CompilerParams(dimension_semantics=dimension_semantics,
                                vmem_limit_bytes=_vmem_limit_bytes())


# ---------------------------------------------------------------------------
# Linear projection kernels (tiled over N x M, weight column VMEM-resident)
# ---------------------------------------------------------------------------
def _linear_nobias_kernel(x_ref, w_ref, o_ref):
    x = x_ref[...].astype(w_ref.dtype)                 # bf16 MXU operands
    o_ref[...] = jnp.dot(x, w_ref[...],
                         preferred_element_type=jnp.float32).astype(o_ref.dtype)


def _linear_bias_kernel(x_ref, w_ref, b_ref, o_ref):
    x = x_ref[...].astype(w_ref.dtype)
    acc = jnp.dot(x, w_ref[...], preferred_element_type=jnp.float32)
    o_ref[...] = (acc + b_ref[...]).astype(o_ref.dtype)


def linear_pallas(x, w, b=None, *, out_dtype=None, max_tm=512, max_tn=512):
    """y = x @ w (+ b).  x: [M, K] (any float dtype), w: [K, N] (pre-cast to the
    MXU compute dtype, e.g. bf16), b: [N] (f32) or None.

    Grid is (N tiles, M tiles) with M innermost, so the weight block for the
    current N column stays resident in VMEM while activation tiles stream.
    M is padded up to the chosen tile so awkward row counts never force a
    single oversized block.
    """
    M, K = x.shape
    Kw, N = w.shape
    assert K == Kw, (K, Kw)
    out_dtype = out_dtype if out_dtype is not None else x.dtype

    TN = _pick_tile(N, max_tn, 128)
    TM = min(max_tm, _round_up(M, 8))
    Mp = _round_up(M, TM)
    xp = jnp.pad(x, ((0, Mp - M), (0, 0))) if Mp != M else x

    grid = (N // TN, Mp // TM)                         # M innermost
    x_spec = pl.BlockSpec((TM, K), lambda j, i: (i, 0))
    w_spec = pl.BlockSpec((K, TN), lambda j, i: (0, j))  # constant across inner M loop
    o_spec = pl.BlockSpec((TM, TN), lambda j, i: (i, j))
    cp = _compiler_params(("parallel", "parallel"))
    out_shape = jax.ShapeDtypeStruct((Mp, N), out_dtype)

    if b is None:
        out = pl.pallas_call(
            _linear_nobias_kernel, out_shape=out_shape, grid=grid,
            in_specs=[x_spec, w_spec], out_specs=o_spec, compiler_params=cp,
        )(xp, w)
    else:
        b2 = b.reshape(1, N).astype(jnp.float32)
        b_spec = pl.BlockSpec((1, TN), lambda j, i: (0, j))
        out = pl.pallas_call(
            _linear_bias_kernel, out_shape=out_shape, grid=grid,
            in_specs=[x_spec, w_spec, b_spec], out_specs=o_spec, compiler_params=cp,
        )(xp, w, b2)

    return out[:M] if Mp != M else out


# ---------------------------------------------------------------------------
# Attention kernel: grid (B*H, q-tile, kv-tile), online softmax over kv tiles.
# Inputs are [B*H, S, D]; softmax scale is pre-folded into q.
# ---------------------------------------------------------------------------
def _attention_kernel(q_ref, k_ref, v_ref, o_ref, m_sc, l_sc, acc_sc,
                      *, kv_len, tkv):
    kv_i = pl.program_id(2)

    @pl.when(kv_i == 0)
    def _init():
        m_sc[...] = jnp.full(m_sc.shape, -jnp.inf, dtype=m_sc.dtype)
        l_sc[...] = jnp.zeros(l_sc.shape, dtype=l_sc.dtype)
        acc_sc[...] = jnp.zeros(acc_sc.shape, dtype=acc_sc.dtype)

    q = q_ref[0]          # [TQ, D]  bf16 (scale folded into the Q weight)
    k = k_ref[0]          # [TKV, D] bf16
    v = v_ref[0]          # [TKV, D] bf16

    # q @ k^T contracting the last dims (no explicit transpose); f32 accumulate.
    s = lax.dot_general(q, k, (((1,), (1,)), ((), ())),
                        preferred_element_type=jnp.float32)            # [TQ, TKV]

    if kv_len % tkv != 0:   # static: only emitted when kv padding exists
        col = kv_i * tkv + lax.broadcasted_iota(jnp.int32, s.shape, 1)
        s = jnp.where(col < kv_len, s, jnp.float32(-1e30))

    m_prev = m_sc[...]
    m_new = jnp.maximum(m_prev, jnp.max(s, axis=-1, keepdims=True))
    alpha = jnp.exp(m_prev - m_new)
    p = jnp.exp(s - m_new)
    l_sc[...] = alpha * l_sc[...] + jnp.sum(p, axis=-1, keepdims=True)
    acc_sc[...] = alpha * acc_sc[...] + lax.dot_general(
        p.astype(v.dtype), v, (((1,), (0,)), ((), ())),
        preferred_element_type=jnp.float32)                            # [TQ, D]
    m_sc[...] = m_new

    @pl.when(kv_i == pl.num_programs(2) - 1)
    def _finalize():
        l = l_sc[...]
        inv = pl.reciprocal(l, approx=True)          # EUP slot
        inv = inv * (2.0 - l * inv)                  # one Newton step -> ~f32 accurate
        o_ref[0] = (acc_sc[...] * inv).astype(o_ref.dtype)


def attention_pallas(q, k, v, *, max_tq=256, max_tkv=512):
    """q: [BH, Sq, D], k/v: [BH, Skv, D] -> [BH, Sq, D].

    The softmax scale must already be folded into q (done at param-prep time).
    Sq is padded to the q tile, Skv to a 128-multiple kv tile (padded keys are
    masked in-kernel).  kv axis is innermost and 'arbitrary'; (B*H, q-tile)
    axes are 'parallel' so both v7x TensorCores receive work.
    """
    BH, Sq, D = q.shape
    Skv = k.shape[1]

    TQ = min(max_tq, _round_up(Sq, 8))
    TKV = min(max_tkv, _round_up(Skv, 128))
    Sq_p, Skv_p = _round_up(Sq, TQ), _round_up(Skv, TKV)
    if Sq_p != Sq:
        q = jnp.pad(q, ((0, 0), (0, Sq_p - Sq), (0, 0)))
    if Skv_p != Skv:
        k = jnp.pad(k, ((0, 0), (0, Skv_p - Skv), (0, 0)))
        v = jnp.pad(v, ((0, 0), (0, Skv_p - Skv), (0, 0)))

    grid = (BH, Sq_p // TQ, Skv_p // TKV)              # kv reduction axis last
    kernel = functools.partial(_attention_kernel, kv_len=Skv, tkv=TKV)

    out = pl.pallas_call(
        kernel,
        out_shape=jax.ShapeDtypeStruct((BH, Sq_p, D), q.dtype),
        grid=grid,
        in_specs=[
            pl.BlockSpec((1, TQ, D), lambda b, qi, ki: (b, qi, 0)),
            pl.BlockSpec((1, TKV, D), lambda b, qi, ki: (b, ki, 0)),
            pl.BlockSpec((1, TKV, D), lambda b, qi, ki: (b, ki, 0)),
        ],
        out_specs=pl.BlockSpec((1, TQ, D), lambda b, qi, ki: (b, qi, 0)),
        scratch_shapes=[
            pltpu.VMEM((TQ, 1), jnp.float32),    # running max
            pltpu.VMEM((TQ, 1), jnp.float32),    # running denom
            pltpu.VMEM((TQ, D), jnp.float32),    # running numerator
        ],
        compiler_params=_compiler_params(("parallel", "parallel", "arbitrary")),
    )(q, k, v)

    return out[:, :Sq, :] if Sq_p != Sq else out


# ---------------------------------------------------------------------------
# Parameters
# ---------------------------------------------------------------------------
def init_cross_attention_params(key, query_dim, cross_attention_dim=None,
                                heads=8, dim_head=64, dtype=jnp.float32):
    """Deterministic synthetic parameters, PyTorch Linear weight layout [out, in]."""
    cross_attention_dim = (cross_attention_dim
                           if cross_attention_dim is not None else query_dim)
    inner_dim = heads * dim_head
    k1, k2, k3, k4, k5 = jax.random.split(key, 5)
    return {
        "wq": 0.02 * jax.random.normal(k1, (inner_dim, query_dim), dtype),
        "wk": 0.02 * jax.random.normal(k2, (inner_dim, cross_attention_dim), dtype),
        "wv": 0.02 * jax.random.normal(k3, (inner_dim, cross_attention_dim), dtype),
        "wo": 0.02 * jax.random.normal(k4, (query_dim, inner_dim), dtype),
        "bo": 0.02 * jax.random.normal(k5, (query_dim,), dtype),
    }


def prepare_cross_attention_params(params, *, heads, dim_head,
                                   compute_dtype=jnp.bfloat16):
    """One-time prep: transpose / concat / pre-scale / pre-cast the weights."""
    scale = dim_head ** (-0.5)
    wq_t = (params["wq"].T.astype(jnp.float32) * scale).astype(compute_dtype)
    wkv_t = jnp.concatenate([params["wk"].T, params["wv"].T],
                            axis=1).astype(compute_dtype)       # [C, 2*H*D]
    wo_t = params["wo"].T.astype(compute_dtype)                 # [H*D, query_dim]
    bo = params["bo"].astype(jnp.float32)
    return {"wq_t": wq_t, "wkv_t": wkv_t, "wo_t": wo_t, "bo": bo}


# ---------------------------------------------------------------------------
# CrossAttention forward pass
# ---------------------------------------------------------------------------
def cross_attention_forward(params, hidden_states, encoder_hidden_states=None,
                            *, heads, dim_head):
    """Matches CrossAttention.forward (flash=None / normal_attention path)."""
    B, Sq, query_dim = hidden_states.shape
    ctx = encoder_hidden_states if encoder_hidden_states is not None else hidden_states
    Skv, ctx_dim = ctx.shape[1], ctx.shape[2]
    inner_dim = heads * dim_head
    compute_dtype = params["wq_t"].dtype

    # --- Q projection (scale pre-folded); bf16 output halves downstream HBM ---
    q = linear_pallas(hidden_states.reshape(B * Sq, query_dim), params["wq_t"],
                      out_dtype=compute_dtype)                        # [B*Sq, H*D]

    # --- Fused K|V projection: one ctx read, wide lane-dense N ---
    kv = linear_pallas(ctx.reshape(B * Skv, ctx_dim), params["wkv_t"],
                       out_dtype=compute_dtype)                       # [B*Skv, 2*H*D]

    # --- Head split (XLA layout plumbing, bf16): [B*H, S, D] ---
    q_h = (q.reshape(B, Sq, heads, dim_head)
             .transpose(0, 2, 1, 3).reshape(B * heads, Sq, dim_head))
    kv_h = (kv.reshape(B, Skv, 2, heads, dim_head)
              .transpose(2, 0, 3, 1, 4).reshape(2, B * heads, Skv, dim_head))
    k_h, v_h = kv_h[0], kv_h[1]

    # --- Multi-head attention, heads as a parallel grid axis ---
    o_h = attention_pallas(q_h, k_h, v_h)                             # [B*H, Sq, D]

    # --- Head merge + output projection (bias) + Dropout(0.0) == identity ---
    o = (o_h.reshape(B, heads, Sq, dim_head)
            .transpose(0, 2, 1, 3).reshape(B * Sq, inner_dim))
    out = linear_pallas(o, params["wo_t"], params["bo"],
                        out_dtype=hidden_states.dtype)
    return out.reshape(B, Sq, query_dim)


# ---------------------------------------------------------------------------
# Demo / smoke test
# ---------------------------------------------------------------------------
if __name__ == "__main__":
    # Small config: cross-attention between image tokens and text tokens.
    B = 2
    Sq = 16          # query sequence length
    Skv = 8          # context (encoder) sequence length
    query_dim = 32
    cross_attention_dim = 24
    heads = 4
    dim_head = 8     # inner_dim = 32

    key = jax.random.PRNGKey(0)
    kp, kh_, ke = jax.random.split(key, 3)

    raw_params = init_cross_attention_params(
        kp, query_dim, cross_attention_dim, heads=heads, dim_head=dim_head)
    prepared = prepare_cross_attention_params(raw_params, heads=heads,
                                              dim_head=dim_head)

    hidden_states = jax.random.normal(kh_, (B, Sq, query_dim), jnp.float32)
    encoder_hidden_states = jax.random.normal(ke, (B, Skv, cross_attention_dim),
                                              jnp.float32)

    fwd = jax.jit(functools.partial(cross_attention_forward,
                                    heads=heads, dim_head=dim_head))
    out = jax.block_until_ready(fwd(prepared, hidden_states, encoder_hidden_states))
    assert out.shape == (B, Sq, query_dim), out.shape

    # Pure-JAX f32 reference of the same math (torch's half-split softmax ==
    # plain softmax over dim=-1).
    def ref_forward(h, c):
        q = h @ raw_params["wq"].T
        k = c @ raw_params["wk"].T
        v = c @ raw_params["wv"].T
        qh = q.reshape(B, Sq, heads, dim_head)
        kh = k.reshape(B, Skv, heads, dim_head)
        vh = v.reshape(B, Skv, heads, dim_head)
        attn = jnp.einsum("bihd,bjhd->bhij", qh, kh) * dim_head ** -0.5
        attn = jax.nn.softmax(attn, axis=-1)
        o = jnp.einsum("bhij,bjhd->bihd", attn, vh).reshape(B, Sq, heads * dim_head)
        return o @ raw_params["wo"].T + raw_params["bo"]

    ref = ref_forward(hidden_states, encoder_hidden_states)
    err = float(jnp.abs(out - ref).max())
    # bf16 MXU operands (f32 accumulation) -> tolerance loosened vs pure f32.
    assert jnp.allclose(out, ref, atol=2e-2, rtol=2e-2), err

    print("KERNEL_OK")
</pallas_src>

<mosaic_0001>
module attributes {stable_mosaic.version = 11 : i64} {
  func.func @_linear_nobias_kernel(%arg0: i32, %arg1: i32, %arg2: memref<32x32xf32, #tpu.memory_space<vmem>>, %arg3: memref<32x32xbf16, #tpu.memory_space<vmem>>, %arg4: memref<32x32xbf16, #tpu.memory_space<vmem>>) attributes {dimension_semantics = [#tpu.dimension_semantics<parallel>, #tpu.dimension_semantics<parallel>], iteration_bounds = array<i64: 1, 1>, scalar_prefetch = 0 : i64, scratch_operands = 0 : i64, tpu.core_type = #tpu.core_type<tc>, window_params = [{transform_indices = @transform_0, window_bounds = array<i64: 32, 32>}, {transform_indices = @transform_1, window_bounds = array<i64: 32, 32>}, {transform_indices = @transform_2, window_bounds = array<i64: 32, 32>}]} {
    %c0 = arith.constant 0 : index
    %c0_0 = arith.constant 0 : index
    %0 = vector.load %arg2[%c0, %c0_0] : memref<32x32xf32, #tpu.memory_space<vmem>>, vector<32x32xf32>
    %1 = arith.truncf %0 : vector<32x32xf32> to vector<32x32xbf16>
    %c0_1 = arith.constant 0 : index
    %c0_2 = arith.constant 0 : index
    %2 = vector.load %arg3[%c0_1, %c0_2] : memref<32x32xbf16, #tpu.memory_space<vmem>>, vector<32x32xbf16>
    %cst = arith.constant dense<0.000000e+00> : vector<32x32xf32>
    %3 = tpu.matmul %1, %2, %cst {dimension_numbers = #tpu.dot_dimension_numbers<[1], [0], [0], [1], [0, 0, 1, 1], [], []>} : vector<32x32xbf16>, vector<32x32xbf16>, vector<32x32xf32> -> vector<32x32xf32>
    %4 = arith.truncf %3 : vector<32x32xf32> to vector<32x32xbf16>
    %c0_3 = arith.constant 0 : index
    %c0_4 = arith.constant 0 : index
    %5 = vector.load %arg4[%c0_3, %c0_4] : memref<32x32xbf16, #tpu.memory_space<vmem>>, vector<32x32xbf16>
    tpu.vector_store %arg4[%c0_3, %c0_4], %4 {strides = array<i32>} : memref<32x32xbf16, #tpu.memory_space<vmem>>, vector<32x32xbf16>,
    return
  }
  func.func @transform_0(%arg0: i32, %arg1: i32) -> (i32, i32) {
    %c0_i32 = arith.constant 0 : i32
    %c0_i32_0 = arith.constant 0 : i32
    return %arg1, %c0_i32 : i32, i32
  }
  func.func @transform_1(%arg0: i32, %arg1: i32) -> (i32, i32) {
    %c0_i32 = arith.constant 0 : i32
    %c0_i32_0 = arith.constant 0 : i32
    return %c0_i32, %arg0 : i32, i32
  }
  func.func @transform_2(%arg0: i32, %arg1: i32) -> (i32, i32) {
    %c0_i32 = arith.constant 0 : i32
    return %arg1, %arg0 : i32, i32
  }
}

module attributes {stable_mosaic.version = 11 : i64} {
  func.func @_linear_nobias_kernel(%arg0: i32, %arg1: i32, %arg2: memref<16x24xf32, #tpu.memory_space<vmem>>, %arg3: memref<24x64xbf16, #tpu.memory_space<vmem>>, %arg4: memref<16x64xbf16, #tpu.memory_space<vmem>>) attributes {dimension_semantics = [#tpu.dimension_semantics<parallel>, #tpu.dimension_semantics<parallel>], iteration_bounds = array<i64: 1, 1>, scalar_prefetch = 0 : i64, scratch_operands = 0 : i64, tpu.core_type = #tpu.core_type<tc>, window_params = [{transform_indices = @transform_0, window_bounds = array<i64: 16, 24>}, {transform_indices = @transform_1, window_bounds = array<i64: 24, 64>}, {transform_indices = @transform_2, window_bounds = array<i64: 16, 64>}]} {
    %c0 = arith.constant 0 : index
    %c0_0 = arith.constant 0 : index
    %0 = vector.load %arg2[%c0, %c0_0] : memref<16x24xf32, #tpu.memory_space<vmem>>, vector<16x24xf32>
    %1 = arith.truncf %0 : vector<16x24xf32> to vector<16x24xbf16>
    %c0_1 = arith.constant 0 : index
    %c0_2 = arith.constant 0 : index
    %2 = vector.load %arg3[%c0_1, %c0_2] : memref<24x64xbf16, #tpu.memory_space<vmem>>, vector<24x64xbf16>
    %cst = arith.constant dense<0.000000e+00> : vector<16x64xf32>
    %3 = tpu.matmul %1, %2, %cst {dimension_numbers = #tpu.dot_dimension_numbers<[1], [0], [0], [1], [0, 0, 1, 1], [], []>} : vector<16x24xbf16>, vector<24x64xbf16>, vector<16x64xf32> -> vector<16x64xf32>
    %4 = arith.truncf %3 : vector<16x64xf32> to vector<16x64xbf16>
    %c0_3 = arith.constant 0 : index
    %c0_4 = arith.constant 0 : index
    %5 = vector.load %arg4[%c0_3, %c0_4] : memref<16x64xbf16, #tpu.memory_space<vmem>>, vector<16x64xbf16>
    tpu.vector_store %arg4[%c0_3, %c0_4], %4 {strides = array<i32>} : memref<16x64xbf16, #tpu.memory_space<vmem>>, vector<16x64xbf16>,
    return
  }
  func.func @transform_0(%arg0: i32, %arg1: i32) -> (i32, i32) {
    %c0_i32 = arith.constant 0 : i32
    %c0_i32_0 = arith.constant 0 : i32
    return %arg1, %c0_i32 : i32, i32
  }
  func.func @transform_1(%arg0: i32, %arg1: i32) -> (i32, i32) {
    %c0_i32 = arith.constant 0 : i32
    %c0_i32_0 = arith.constant 0 : i32
    return %c0_i32, %arg0 : i32, i32
  }
  func.func @transform_2(%arg0: i32, %arg1: i32) -> (i32, i32) {
    %c0_i32 = arith.constant 0 : i32
    return %arg1, %arg0 : i32, i32
  }
}

module attributes {stable_mosaic.version = 11 : i64} {
  func.func @_attention_kernel(%arg0: i32, %arg1: i32, %arg2: i32, %arg3: memref<1x16x8xbf16, #tpu.memory_space<vmem>>, %arg4: memref<1x128x8xbf16, #tpu.memory_space<vmem>>, %arg5: memref<1x128x8xbf16, #tpu.memory_space<vmem>>, %arg6: memref<1x16x8xbf16, #tpu.memory_space<vmem>>, %arg7: memref<16x1xf32, #tpu.memory_space<vmem>>, %arg8: memref<16x1xf32, #tpu.memory_space<vmem>>, %arg9: memref<16x8xf32, #tpu.memory_space<vmem>>) attributes {dimension_semantics = [#tpu.dimension_semantics<parallel>, #tpu.dimension_semantics<parallel>, #tpu.dimension_semantics<arbitrary>], iteration_bounds = array<i64: 8, 1, 1>, scalar_prefetch = 0 : i64, scratch_operands = 3 : i64, tpu.core_type = #tpu.core_type<tc>, window_params = [{transform_indices = @transform_0, window_bounds = array<i64: 1, 16, 8>}, {transform_indices = @transform_1, window_bounds = array<i64: 1, 128, 8>}, {transform_indices = @transform_2, window_bounds = array<i64: 1, 128, 8>}, {transform_indices = @transform_3, window_bounds = array<i64: 1, 16, 8>}]} {
    %c0_i32 = arith.constant 0 : i32
    %0 = arith.cmpi eq, %arg2, %c0_i32 : i32
    %1 = arith.extui %0 : i1 to i32
    %c0_i32_0 = arith.constant 0 : i32
    %2 = arith.cmpi ne, %1, %c0_i32_0 : i32
    scf.if %2 {
      %cst_27 = arith.constant 0xFF800000 : f32
      %44 = vector.broadcast %cst_27 : f32 to vector<16x1xf32>
      %c0_28 = arith.constant 0 : index
      %c0_29 = arith.constant 0 : index
      %45 = vector.load %arg7[%c0_28, %c0_29] : memref<16x1xf32, #tpu.memory_space<vmem>>, vector<16x1xf32>
      tpu.vector_store %arg7[%c0_28, %c0_29], %44 {strides = array<i32>} : memref<16x1xf32, #tpu.memory_space<vmem>>, vector<16x1xf32>,
      %cst_30 = arith.constant 0.000000e+00 : f32
      %46 = vector.broadcast %cst_30 : f32 to vector<16x1xf32>
      %c0_31 = arith.constant 0 : index
      %c0_32 = arith.constant 0 : index
      %47 = vector.load %arg8[%c0_31, %c0_32] : memref<16x1xf32, #tpu.memory_space<vmem>>, vector<16x1xf32>
      tpu.vector_store %arg8[%c0_31, %c0_32], %46 {strides = array<i32>} : memref<16x1xf32, #tpu.memory_space<vmem>>, vector<16x1xf32>,
      %cst_33 = arith.constant 0.000000e+00 : f32
      %48 = vector.broadcast %cst_33 : f32 to vector<16x8xf32>
      %c0_34 = arith.constant 0 : index
      %c0_35 = arith.constant 0 : index
      %49 = vector.load %arg9[%c0_34, %c0_35] : memref<16x8xf32, #tpu.memory_space<vmem>>, vector<16x8xf32>
      tpu.vector_store %arg9[%c0_34, %c0_35], %48 {strides = array<i32>} : memref<16x8xf32, #tpu.memory_space<vmem>>, vector<16x8xf32>,
    } else {
    }
    %c0 = arith.constant 0 : index
    %c0_1 = arith.constant 0 : index
    %c0_2 = arith.constant 0 : index
    %3 = vector.load %arg3[%c0, %c0_1, %c0_2] : memref<1x16x8xbf16, #tpu.memory_space<vmem>>, vector<1x16x8xbf16>
    %4 = vector.shape_cast %3 : vector<1x16x8xbf16> to vector<16x8xbf16>
    %c0_3 = arith.constant 0 : index
    %c0_4 = arith.constant 0 : index
    %c0_5 = arith.constant 0 : index
    %5 = vector.load %arg4[%c0_3, %c0_4, %c0_5] : memref<1x128x8xbf16, #tpu.memory_space<vmem>>, vector<1x128x8xbf16>
    %6 = vector.shape_cast %5 : vector<1x128x8xbf16> to vector<128x8xbf16>
    %c0_6 = arith.constant 0 : index
    %c0_7 = arith.constant 0 : index
    %c0_8 = arith.constant 0 : index
    %7 = vector.load %arg5[%c0_6, %c0_7, %c0_8] : memref<1x128x8xbf16, #tpu.memory_space<vmem>>, vector<1x128x8xbf16>
    %8 = vector.shape_cast %7 : vector<1x128x8xbf16> to vector<128x8xbf16>
    %cst = arith.constant dense<0.000000e+00> : vector<16x128xf32>
    %9 = tpu.matmul %4, %6, %cst {dimension_numbers = #tpu.dot_dimension_numbers<[1], [1], [0], [0], [0, 0, 1, 0], [], []>} : vector<16x8xbf16>, vector<128x8xbf16>, vector<16x128xf32> -> vector<16x128xf32>
    %c128_i32 = arith.constant 128 : i32
    %10 = arith.muli %arg2, %c128_i32 : i32
    %11 = tpu.iota {dimensions = array<i32: 1>} : vector<16x128xi32>
    %12 = vector.broadcast %10 : i32 to vector<16x128xi32>
    %13 = arith.addi %12, %11 : vector<16x128xi32>
    %c8_i32 = arith.constant 8 : i32
    %14 = vector.broadcast %c8_i32 : i32 to vector<16x128xi32>
    %15 = arith.cmpi slt, %13, %14 : vector<16x128xi32>
    %cst_9 = arith.constant -1.000000e+30 : f32
    %16 = vector.broadcast %cst_9 : f32 to vector<16x128xf32>
    %17 = arith.select %15, %9, %16 : vector<16x128xi1>, vector<16x128xf32>
    %c0_10 = arith.constant 0 : index
    %c0_11 = arith.constant 0 : index
    %18 = vector.load %arg7[%c0_10, %c0_11] : memref<16x1xf32, #tpu.memory_space<vmem>>, vector<16x1xf32>
    %cst_12 = arith.constant dense<0xFF800000> : vector<16xf32>
    %19 = vector.multi_reduction <maximumf>, %17, %cst_12 [1] : vector<16x128xf32> to vector<16xf32>
    %20 = vector.shape_cast %19 : vector<16xf32> to vector<16x1xf32>
    %21 = arith.maximumf %18, %20 : vector<16x1xf32>
    %22 = arith.subf %18, %21 : vector<16x1xf32>
    %23 = math.exp %22 : vector<16x1xf32>
    %24 = vector.broadcast %21 : vector<16x1xf32> to vector<16x128xf32>
    %25 = arith.subf %17, %24 : vector<16x128xf32>
    %26 = math.exp %25 : vector<16x128xf32>
    %c0_13 = arith.constant 0 : index
    %c0_14 = arith.constant 0 : index
    %27 = vector.load %arg8[%c0_13, %c0_14] : memref<16x1xf32, #tpu.memory_space<vmem>>, vector<16x1xf32>
    %28 = arith.mulf %23, %27 : vector<16x1xf32>
    %cst_15 = arith.constant dense<0.000000e+00> : vector<16xf32>
    %29 = vector.multi_reduction <add>, %26, %cst_15 [1] : vector<16x128xf32> to vector<16xf32>
    %30 = vector.shape_cast %29 : vector<16xf32> to vector<16x1xf32>
    %31 = arith.addf %28, %30 : vector<16x1xf32>
    %c0_16 = arith.constant 0 : index
    %c0_17 = arith.constant 0 : index
    %32 = vector.load %arg8[%c0_16, %c0_17] : memref<16x1xf32, #tpu.memory_space<vmem>>, vector<16x1xf32>
    tpu.vector_store %arg8[%c0_16, %c0_17], %31 {strides = array<i32>} : memref<16x1xf32, #tpu.memory_space<vmem>>, vector<16x1xf32>,
    %c0_18 = arith.constant 0 : index
    %c0_19 = arith.constant 0 : index
    %33 = vector.load %arg9[%c0_18, %c0_19] : memref<16x8xf32, #tpu.memory_space<vmem>>, vector<16x8xf32>
    %34 = vector.broadcast %23 : vector<16x1xf32> to vector<16x8xf32>
    %35 = arith.mulf %34, %33 : vector<16x8xf32>
    %36 = arith.truncf %26 : vector<16x128xf32> to vector<16x128xbf16>
    %cst_20 = arith.constant dense<0.000000e+00> : vector<16x8xf32>
    %37 = tpu.matmul %36, %8, %cst_20 {dimension_numbers = #tpu.dot_dimension_numbers<[1], [0], [0], [1], [0, 0, 1, 1], [], []>} : vector<16x128xbf16>, vector<128x8xbf16>, vector<16x8xf32> -> vector<16x8xf32>
    %38 = arith.addf %35, %37 : vector<16x8xf32>
    %c0_21 = arith.constant 0 : index
    %c0_22 = arith.constant 0 : index
    %39 = vector.load %arg9[%c0_21, %c0_22] : memref<16x8xf32, #tpu.memory_space<vmem>>, vector<16x8xf32>
    tpu.vector_store %arg9[%c0_21, %c0_22], %38 {strides = array<i32>} : memref<16x8xf32, #tpu.memory_space<vmem>>, vector<16x8xf32>,
    %c0_23 = arith.constant 0 : index
    %c0_24 = arith.constant 0 : index
    %40 = vector.load %arg7[%c0_23, %c0_24] : memref<16x1xf32, #tpu.memory_space<vmem>>, vector<16x1xf32>
    tpu.vector_store %arg7[%c0_23, %c0_24], %21 {strides = array<i32>} : memref<16x1xf32, #tpu.memory_space<vmem>>, vector<16x1xf32>,
    %c0_i32_25 = arith.constant 0 : i32
    %41 = arith.cmpi eq, %arg2, %c0_i32_25 : i32
    %42 = arith.extui %41 : i1 to i32
    %c0_i32_26 = arith.constant 0 : i32
    %43 = arith.cmpi ne, %42, %c0_i32_26 : i32
    scf.if %43 {
      %c0_27 = arith.constant 0 : index
      %c0_28 = arith.constant 0 : index
      %44 = vector.load %arg8[%c0_27, %c0_28] : memref<16x1xf32, #tpu.memory_space<vmem>>, vector<16x1xf32>
      %45 = tpu.reciprocal %44 {approx = true} : vector<16x1xf32> -> vector<16x1xf32>
      %46 = arith.mulf %44, %45 : vector<16x1xf32>
      %cst_29 = arith.constant 2.000000e+00 : f32
      %47 = vector.broadcast %cst_29 : f32 to vector<16x1xf32>
      %48 = arith.subf %47, %46 : vector<16x1xf32>
      %49 = arith.mulf %45, %48 : vector<16x1xf32>
      %c0_30 = arith.constant 0 : index
      %c0_31 = arith.constant 0 : index
      %50 = vector.load %arg9[%c0_30, %c0_31] : memref<16x8xf32, #tpu.memory_space<vmem>>, vector<16x8xf32>
      %51 = vector.broadcast %49 : vector<16x1xf32> to vector<16x8xf32>
      %52 = arith.mulf %50, %51 : vector<16x8xf32>
      %53 = arith.truncf %52 : vector<16x8xf32> to vector<16x8xbf16>
      %c0_32 = arith.constant 0 : index
      %c0_33 = arith.constant 0 : index
      %c0_34 = arith.constant 0 : index
      %54 = vector.load %arg6[%c0_32, %c0_33, %c0_34] : memref<1x16x8xbf16, #tpu.memory_space<vmem>>, vector<1x16x8xbf16>
      %55 = vector.shape_cast %54 : vector<1x16x8xbf16> to vector<16x8xbf16>
      %56 = vector.shape_cast %53 : vector<16x8xbf16> to vector<1x16x8xbf16>
      tpu.vector_store %arg6[%c0_32, %c0_33, %c0_34], %56 {strides = array<i32>} : memref<1x16x8xbf16, #tpu.memory_space<vmem>>, vector<1x16x8xbf16>,
    } else {
    }
    return
  }
  func.func @transform_0(%arg0: i32, %arg1: i32, %arg2: i32) -> (i32, i32, i32) {
    %c0_i32 = arith.constant 0 : i32
    %c0_i32_0 = arith.constant 0 : i32
    return %arg0, %arg1, %c0_i32 : i32, i32, i32
  }
  func.func @transform_1(%arg0: i32, %arg1: i32, %arg2: i32) -> (i32, i32, i32) {
    %c0_i32 = arith.constant 0 : i32
    %c0_i32_0 = arith.constant 0 : i32
    return %arg0, %arg2, %c0_i32 : i32, i32, i32
  }
  func.func @transform_2(%arg0: i32, %arg1: i32, %arg2: i32) -> (i32, i32, i32) {
    %c0_i32 = arith.constant 0 : i32
    %c0_i32_0 = arith.constant 0 : i32
    return %arg0, %arg2, %c0_i32 : i32, i32, i32
  }
  func.func @transform_3(%arg0: i32, %arg1: i32, %arg2: i32) -> (i32, i32, i32) {
    %c0_i32 = arith.constant 0 : i32
    %c0_i32_0 = arith.constant 0 : i32
    return %arg0, %arg1, %c0_i32 : i32, i32, i32
  }
}

module attributes {stable_mosaic.version = 11 : i64} {
  func.func @_linear_bias_kernel(%arg0: i32, %arg1: i32, %arg2: memref<32x32xbf16, #tpu.memory_space<vmem>>, %arg3: memref<32x32xbf16, #tpu.memory_space<vmem>>, %arg4: memref<1x32xf32, #tpu.memory_space<vmem>>, %arg5: memref<32x32xf32, #tpu.memory_space<vmem>>) attributes {dimension_semantics = [#tpu.dimension_semantics<parallel>, #tpu.dimension_semantics<parallel>], iteration_bounds = array<i64: 1, 1>, scalar_prefetch = 0 : i64, scratch_operands = 0 : i64, tpu.core_type = #tpu.core_type<tc>, window_params = [{transform_indices = @transform_0, window_bounds = array<i64: 32, 32>}, {transform_indices = @transform_1, window_bounds = array<i64: 32, 32>}, {transform_indices = @transform_2, window_bounds = array<i64: 1, 32>}, {transform_indices = @transform_3, window_bounds = array<i64: 32, 32>}]} {
    %c0 = arith.constant 0 : index
    %c0_0 = arith.constant 0 : index
    %0 = vector.load %arg2[%c0, %c0_0] : memref<32x32xbf16, #tpu.memory_space<vmem>>, vector<32x32xbf16>
    %c0_1 = arith.constant 0 : index
    %c0_2 = arith.constant 0 : index
    %1 = vector.load %arg3[%c0_1, %c0_2] : memref<32x32xbf16, #tpu.memory_space<vmem>>, vector<32x32xbf16>
    %cst = arith.constant dense<0.000000e+00> : vector<32x32xf32>
    %2 = tpu.matmul %0, %1, %cst {dimension_numbers = #tpu.dot_dimension_numbers<[1], [0], [0], [1], [0, 0, 1, 1], [], []>} : vector<32x32xbf16>, vector<32x32xbf16>, vector<32x32xf32> -> vector<32x32xf32>
    %c0_3 = arith.constant 0 : index
    %c0_4 = arith.constant 0 : index
    %3 = vector.load %arg4[%c0_3, %c0_4] : memref<1x32xf32, #tpu.memory_space<vmem>>, vector<1x32xf32>
    %4 = vector.broadcast %3 : vector<1x32xf32> to vector<32x32xf32>
    %5 = arith.addf %2, %4 : vector<32x32xf32>
    %c0_5 = arith.constant 0 : index
    %c0_6 = arith.constant 0 : index
    %6 = vector.load %arg5[%c0_5, %c0_6] : memref<32x32xf32, #tpu.memory_space<vmem>>, vector<32x32xf32>
    tpu.vector_store %arg5[%c0_5, %c0_6], %5 {strides = array<i32>} : memref<32x32xf32, #tpu.memory_space<vmem>>, vector<32x32xf32>,
    return
  }
  func.func @transform_0(%arg0: i32, %arg1: i32) -> (i32, i32) {
    %c0_i32 = arith.constant 0 : i32
    %c0_i32_0 = arith.constant 0 : i32
    return %arg1, %c0_i32 : i32, i32
  }
  func.func @transform_1(%arg0: i32, %arg1: i32) -> (i32, i32) {
    %c0_i32 = arith.constant 0 : i32
    %c0_i32_0 = arith.constant 0 : i32
    return %c0_i32, %arg0 : i32, i32
  }
  func.func @transform_2(%arg0: i32, %arg1: i32) -> (i32, i32) {
    %c0_i32 = arith.constant 0 : i32
    %c0_i32_0 = arith.constant 0 : i32
    return %c0_i32, %arg0 : i32, i32
  }
  func.func @transform_3(%arg0: i32, %arg1: i32) -> (i32, i32) {
    %c0_i32 = arith.constant 0 : i32
    return %arg1, %arg0 : i32, i32
  }
}

</mosaic_0001>

<bundles_post_ra>
// kernel: cross_attention_forward.5
= control target key start
LH: loop header
LB: loop body
LE: loop exit
PB: predicated region body
PF: predicated region fallthrough
CT: control target
= control target key end

     0   :  { %7 = vsyncpa [#allocation3], 0  ;;  %s155_s9 = smov [#allocation2]   ;;  %s199_s0 = inlined_call_operand.vmem [shape: f32[16,24], index: 0, kind: input, shape index: {}]   ;;  %s200_s1 = inlined_call_operand.hbm [shape: bf16[24,64], index: 1, kind: input, shape index: {}]   ;;  %s201_s2 = inlined_call_operand.vmem [shape: bf16[16,64], index: 2, kind: output, shape index: {}]  }
   0x1   :  { %s15_s10 = sshll.u32 %s155_s9, 4  ;;  %s131_s13 = scalar_lea.hbm %s200_s1, 192  ;;  %s16_s10 = int_to_ptr.vmem [resolvable:$true] %s15_s10 }
   0x2   :  { %p132_p0 = scmp.ne.s32.totalorder %s200_s1, %s131_s13  ;;  %p135_p1 = scmp.lt.u32.totalorder %s131_s13, %s200_s1 }
   0x4   :  { %p137_p2 = pnand %p135_p1, %p132_p0 }
   0x6   :  { %140 = shalt.err (!%p137_p2)
}
   0x7   :  { %s141_s18 = scalar_lea.vmem %s16_s10, 192  ;;  %p146_p4 = scmp.lt.s32.totalorder %s16_s10, %s16_s10 }
   0x8   :  { %p142_p3 = scmp.ne.s32.totalorder %s16_s10, %s141_s18  ;;  %p147_p5 = scmp.lt.s32.totalorder %s141_s18, %s141_s18 }
   0xa   :  { %p148_p6 = por %p147_p5, %p146_p4 }
   0xc   :  { %p149_p7 = pnand %p148_p6, %p142_p3 }
   0xe   :  { %152 = shalt.err (!%p149_p7)
}
   0xf   :  { %s156_s19 = smov 64   ;;  %s157_s20 = smov 4  }
  0x10   :  { %21 = dma.hbm_to_vmem [thread:$0]  %s200_s1, 192, %s16_s10, [#allocation3], %s156_s19, %s156_s19, %s157_s20  }
  0x11   :  { %153 = dma.done.wait [#allocation3], 192  }
  0x12   :  { %154 = vsyncadd [#allocation3], 4294967104  ;;  %v158_v0 = vmov 0.0   ;;  %vm159_vm0 = vmmov 0   ;;  %v129_v1 = vld [vmem:[#allocation2] sm:$0xff]   ;;  %vm45_vm1 = vcmask 1043456  }
  0x13   :  { %116 = vmatprep.subr.bf16.mxu0 %v158_v0  ;;  %120 = vmatprep.mubr.msk.bf16.mxu0 %vm159_vm0, %v158_v0  ;;  %v130_v2 = vld [vmem:[#allocation2 + $0x8] ss:$0 sps:$4 sm:$0xff]   ;;  %v26_v3 = vld [vmem:[%s199_s0] sm:$0xff]  ;;  %vm41_vm2 = vcmask 195584   ;;  %vm98_vm3 = vcmask 519168  }
  0x14   :  { %117 = vmatpush3.bf16.msra.mxu0 %v129_v1  ;;  %v27_v4 = vld [vmem:[%s199_s0 + $0x8] sm:$0xff]  ;;  %v47_v5 = vsel %vm45_vm1, %v130_v2, 0 }
  0x15   :  { %118 = vmatprep.subr.bf16.mxu0 %v158_v0  ;;  %v28_v6 = vpack.c.bf16 %v27_v4, %v26_v3 }
  0x18   :  { %119 = vmatpush3.bf16.msra.mxu0 %v47_v5 }
  0x1b   :  { %121 = vmatmul.mubr.msk.bf16.vlgmr.msra.gmra.mrb[0].mxu0 %vm41_vm2, %v28_v6 }
  0xee   :  { %v83_v7 = vpop.f32.mrb[0].mxu0 }
  0xef   :  { %v111_v8 = vpack.c.bf16 %v83_v7, %v83_v7  ;;  %v122_v9 = vpop.f32.mrb[1].mxu0 }
  0xf0   :  { %v86_v10 = vpop.f32.mrb[2].mxu0 }
  0xf1   :  { %99 = vst.msk [vmem:[%s201_s2] sm:$0xf] %vm98_vm3, %v111_v8  ;;  %v112_v11 = vpack.c.bf16 %v86_v10, %v86_v10  ;;  %v123_v12 = vpop.f32.mrb[3].mxu0 }
  0xf3   :  { %100 = vst.msk [vmem:[%s201_s2 + $0x4] sm:$0xf] %vm98_vm3, %v112_v11 }
  0xf4   :  { %105 = vsyncpa [#allocation3], 1 }

// kernel: cross_attention_forward.4
= control target key start
LH: loop header
LB: loop body
LE: loop exit
PB: predicated region body
PF: predicated region fallthrough
CT: control target
= control target key end

     0   :  { %vm34_vm0 = vcmask 261120   ;;  %vm106_vm1 = vcmask 257024   ;;  %s186_s1 = inlined_call_operand.vmem [shape: bf16[32,32], index: 1, kind: input, shape index: {}]   ;;  %s187_s0 = inlined_call_operand.vmem [shape: f32[32,32], index: 0, kind: input, shape index: {}]   ;;  %s188_s2 = inlined_call_operand.vmem [shape: bf16[32,32], index: 2, kind: output, shape index: {}]  }
   0x1   :  { %v139_v0 = vld [vmem:[%s186_s1] sm:$0xff]   ;;  %v140_v1 = vld [vmem:[%s186_s1 + $0x8] sm:$0xff]   ;;  %v14_v5 = vld [vmem:[%s187_s0 + $0x10] sm:$0xff] }
   0x2   :  { %131 = vmatprep.subr.bf16.mxu0 %v139_v0  ;;  %v12_v2 = vld [vmem:[%s187_s0] sm:$0xff]  ;;  %v13_v3 = vld [vmem:[%s187_s0 + $0x8] sm:$0xff]  ;;  %v15_v6 = vld [vmem:[%s187_s0 + $0x18] sm:$0xff] }
   0x3   :  { %132 = vmatpush3.bf16.msra.mxu0 %v139_v0  ;;  %v16_v4 = vpack.c.bf16 %v13_v3, %v12_v2  ;;  %v17_v7 = vpack.c.bf16 %v15_v6, %v14_v5 }
   0x4   :  { %133 = vmatprep.subr.bf16.mxu0 %v140_v1 }
   0x5   :  { %135 = vmatprep.mubr.msk.bf16.mxu0 %vm34_vm0, %v16_v4 }
   0x7   :  { %134 = vmatpush3.bf16.msra.mxu0 %v140_v1 }
   0xa   :  { %136 = vmatmul.mubr.msk.bf16.vlgmr.msra.gmra.mrb[0].mxu0 %vm34_vm0, %v17_v7 }
  0xdd   :  { %v137_v8 = vpop.f32.mrb[0].mxu0 }
  0xde   :  { %v125_v9 = vpack.c.bf16 %v137_v8, %v137_v8  ;;  %v75_v10 = vpop.f32.mrb[1].mxu0 }
  0xdf   :  { %v123_v11 = vpack.c.bf16 %v75_v10, %v75_v10  ;;  %v138_v12 = vpop.f32.mrb[2].mxu0 }
  0xe0   :  { %109 = vst.msk [vmem:[%s188_s2 + $0x8] sm:$0xf] %vm106_vm1, %v125_v9  ;;  %v126_v13 = vpack.c.bf16 %v138_v12, %v138_v12  ;;  %v78_v14 = vpop.f32.mrb[3].mxu0 }
  0xe1   :  { %107 = vst.msk [vmem:[%s188_s2] sm:$0xf] %vm106_vm1, %v123_v11  ;;  %v124_v15 = vpack.c.bf16 %v78_v14, %v78_v14 }
  0xe2   :  { %110 = vst.msk [vmem:[%s188_s2 + $0xc] sm:$0xf] %vm106_vm1, %v126_v13 }
  0xe3   :  { %108 = vst.msk [vmem:[%s188_s2 + $0x4] sm:$0xf] %vm106_vm1, %v124_v15 }

// kernel: cross_attention_forward.7
= control target key start
LH: loop header
LB: loop body
LE: loop exit
PB: predicated region body
PF: predicated region fallthrough
CT: control target
= control target key end

     0   :  { %vm53_vm0 = vcmask 261120   ;;  %s235_s0 = inlined_call_operand.vmem [shape: bf16[32,32], index: 0, kind: input, shape index: {}]   ;;  %s236_s1 = inlined_call_operand.vmem [shape: bf16[32,32], index: 1, kind: input, shape index: {}]   ;;  %s237_s2 = inlined_call_operand.vmem [shape: f32[1,32], index: 2, kind: input, shape index: {}]   ;;  %s238_s3 = inlined_call_operand.hbm [shape: f32[32,32], index: 3, kind: output, shape index: {}]  }
   0x1   :  { %v151_v0 = vld [vmem:[%s236_s1] sm:$0xff]   ;;  %v152_v1 = vld [vmem:[%s236_s1 + $0x8] sm:$0xff]  }
   0x2   :  { %140 = vmatprep.subr.bf16.mxu0 %v151_v0  ;;  %v153_v2 = vld [vmem:[%s235_s0] sm:$0xff]  }
   0x3   :  { %141 = vmatpush3.bf16.msra.mxu0 %v151_v0  ;;  %144 = vmatprep.mubr.msk.bf16.mxu0 %vm53_vm0, %v153_v2 }
   0x4   :  { %142 = vmatprep.subr.bf16.mxu0 %v152_v1 }
   0x5   :  { %8 = vsyncpa [#allocation3], 0  ;;  %v154_v3 = vld [vmem:[%s235_s0 + $0x8] sm:$0xff]   ;;  %v129_v4 = vld [vmem:[%s237_s2] ss:$0 sm:$0xff]  ;;  %s179_s21 = smov [#allocation2]  }
   0x6   :  { %s118_s22 = sshll.u32 %s179_s21, 4  ;;  %s119_s22 = int_to_ptr.vmem [resolvable:$true] %s118_s22 }
   0x7   :  { %143 = vmatpush3.bf16.msra.mxu0 %v152_v1  ;;  %s155_s0 = scalar_lea.vmem %s119_s22, 512  ;;  %p160_p1 = scmp.lt.s32.totalorder %s119_s22, %s119_s22 }
   0x8   :  { %p156_p0 = scmp.ne.s32.totalorder %s119_s22, %s155_s0  ;;  %p161_p2 = scmp.lt.s32.totalorder %s155_s0, %s155_s0 }
   0xa   :  { %145 = vmatmul.mubr.msk.bf16.vlgmr.msra.gmra.mrb[0].mxu0 %vm53_vm0, %v154_v3  ;;  %p162_p3 = por %p161_p2, %p160_p1 }
   0xc   :  { %p163_p4 = pnand %p162_p3, %p156_p0 }
  0xdd   :  { %v146_v5 = vpop.f32.mrb[0].mxu0 }
  0xde   :  { %v103_v6 = vadd.f32 %v146_v5, %v129_v4  ;;  %v94_v7 = vpop.f32.mrb[1].mxu0 }
  0xdf   :  { %v95_v8 = vadd.f32 %v129_v4, %v94_v7  ;;  %v147_v9 = vpop.f32.mrb[2].mxu0 }
  0xe0   :  { %111 = vst.msk [vmem:[#allocation2 + $0x10] sm:$0xff] %vm53_vm0, %v103_v6  ;;  %v106_v10 = vadd.f32 %v147_v9, %v129_v4  ;;  %v97_v11 = vpop.f32.mrb[3].mxu0 }
  0xe1   :  { %109 = vst.msk [vmem:[#allocation2] sm:$0xff] %vm53_vm0, %v95_v8  ;;  %v98_v12 = vadd.f32 %v129_v4, %v97_v11 }
  0xe2   :  { %112 = vst.msk [vmem:[#allocation2 + $0x18] sm:$0xff] %vm53_vm0, %v106_v10 }
  0xe3   :  { %110 = vst.msk [vmem:[#allocation2 + $0x8] sm:$0xff] %vm53_vm0, %v98_v12 }
  0xe4   :  { %166 = shalt.err (!%p163_p4)
}
  0xe5   :  { %s167_s24 = scalar_lea.hbm %s238_s3, 512 }
  0xe6   :  { %p168_p5 = scmp.ne.s32.totalorder %s238_s3, %s167_s24  ;;  %p171_p6 = scmp.lt.u32.totalorder %s167_s24, %s238_s3 }
  0xe8   :  { %p173_p7 = pnand %p171_p6, %p168_p5 }
  0xea   :  { %176 = shalt.err (!%p173_p7)
}
  0xeb   :  { %s180_s29 = smov 128   ;;  %s181_s30 = smov 8  }
  0xec   :  { %124 = dma.vmem_to_hbm [thread:$0]  %s119_s22, 512, %s238_s3, [#allocation3], %s180_s29, %s180_s29, %s181_s30  }
  0xed   :  { %177 = dma.done.wait [#allocation3], 512  }
  0xee   :  { %178 = vsyncadd [#allocation3], 4294966784 }
  0xef   :  { %128 = vsyncpa [#allocation3], 1 }

// kernel: cross_attention_forward.6
= control target key start
LH: loop header
LB: loop body
LE: loop exit
PB: predicated region body
PF: predicated region fallthrough
CT: control target
= control target key end

     0   :  { %s981_s12 = smov 0   ;;  %s983_s13 = smov 0   ;;  %s1095_s0 = inlined_call_operand.vmem [shape: bf16[8,16,8], index: 0, kind: input, shape index: {}]   ;;  %s1096_s1 = inlined_call_operand.vmem [shape: bf16[8,128,8], index: 1, kind: input, shape index: {}]   ;;  %s1097_s2 = inlined_call_operand.vmem [shape: bf16[8,128,8], index: 2, kind: input, shape index: {}]   ;;  %s1098_s3 = inlined_call_operand.vmem [shape: bf16[8,16,8], index: 3, kind: output, shape index: {}]  }
   0x1   :  { %s985_s14 = smov 0  }
   0x2 LB: > { %s32_s15 = sadd.s32 1, %s951_s13  ;;  %p779_p0 = scmp.ge.s32.totalorder %s955_s14, 1  ;;  %s955_s14 = sphi %s985_s14, %s13_s14   ;;  %s951_s13 = sphi %s983_s13, %s1100_s13   ;;  %s947_s12 = sphi %s981_s12, %s1099_s12  }
   0x3   : > { %p34_p1 = scmp.ge.s32.totalorder %s32_s15, 8  ;;  %p199_p2 = scmp.lt.s32.totalorder %s955_s14, 9 }
   0x5   : > { %s1102_s15 = smov (%p34_p1, %s32_s15), 0  ;;  %p200_p3 = pnand %p779_p0, %p199_p2 }
   0x6   : > { %p250_p4 = scmp.lt.s32.totalorder (!%p200_p3), %s947_s12, 7  ;;  %vm299_vm0 = vcmask (!%p200_p3), 64512   ;;  %v957_v0 = vmov (!%p200_p3), 0.0   ;;  %vm958_vm1 = vmmov (!%p200_p3), 0   ;;  %vm294_vm2 = vcmask (!%p200_p3), 7168  }
   0x7   : > { %203 = sbr.rel (%p200_p3) target bundleno = 888 (0x378), region = 32  ;;  %834 = vmatprep.subr.bf16.mxu0 (!%p200_p3), %v957_v0  ;;  %300 = vst.msk [vmem:[#allocation4] sm:$0xff] (!%p200_p3), %vm299_vm0, %v957_v0  ;;  %301 = vst.msk [vmem:[#allocation4 + $0x8] sm:$0xff] (!%p200_p3), %vm299_vm0, %v957_v0  ;;  %850 = vmatprep.mubr.msk.bf16.mxu0 (!%p200_p3), %vm958_vm1, %v957_v0  ;;  %v959_v18 = vmov (!%p200_p3), -inf   ;;  %v451_v19 = vlaneseq (!%p200_p3)  ;;  %v960_v27 = vmov (!%p200_p3), 0   ;;  %vm646_vm4 = vcmask (!%p200_p3), 60416  }
   0x8   : > { %854 = vmatprep.subr.bf16.mxu1 (!%p200_p3), %v957_v0  ;;  %870 = vmatprep.mubr.msk.bf16.mxu1 (!%p200_p3), %vm958_vm1, %v957_v0  ;;  %295 = vst.msk [vmem:[#allocation2] sm:$0xff] (!%p200_p3), %vm294_vm2, %v959_v18  ;;  %296 = vst.msk [vmem:[#allocation2 + $0x8] sm:$0xff] (!%p200_p3), %vm294_vm2, %v959_v18 }
   0x9   : > { %297 = vst.msk [vmem:[#allocation3] sm:$0xff] (!%p200_p3), %vm294_vm2, %v957_v0  ;;  %298 = vst.msk [vmem:[#allocation3 + $0x8] sm:$0xff] (!%p200_p3), %vm294_vm2, %v957_v0  ;;  %v452_v20 = vand.u32 (!%p200_p3), 127, %v451_v19  ;;  %902 = vset.pattern.permute.xlu1 (!%p200_p3), %v960_v27  ;;  %903 = vset.pattern.permute.xlu0 (!%p200_p3), %v960_v27 }
   0xb   : > { %vm455_vm3 = vcmp.lt.s32.totalorder (!%p200_p3), %v452_v20, 8 }
   0xe   : > { %s1104_s12 = smov (!%p250_p4, %s947_s12), 7 }
   0xf   : > { %s811_s16 = sshll.u32 %s1104_s12, 6  ;;  %s810_s20 = sshll.u32 %s1104_s12, 3  ;;  %v458_v31 = vld [vmem:[#allocation2] sm:$0xff]  ;;  %v459_v34 = vld [vmem:[#allocation2 + $0x8] sm:$0xff] }
  0x10   : > { %s1015_s19 = scalar_lea.vmem %s1096_s1, %s811_s16  ;;  %s257_s23 = scalar_lea.vmem %s1095_s0, %s810_s20  ;;  %v488_v57 = vld [vmem:[#allocation3] sm:$0xff]  ;;  %v489_v60 = vld [vmem:[#allocation3 + $0x8] sm:$0xff] }
  0x11   : > { %v904_v1 = vld [vmem:[%s1015_s19] sm:$0xff]   ;;  %v905_v3 = vld [vmem:[%s1015_s19 + $0x8] sm:$0xff]   ;;  %v906_v5 = vld [vmem:[%s1015_s19 + $0x10] sm:$0xff]   ;;  %s1058_s26 = scalar_lea.vmem %s1097_s2, %s811_s16  ;;  %s287_s29 = scalar_lea.vmem %s1098_s3, %s810_s20 }
  0x12   : > { %v386_v2 = vsel %vm299_vm0, %v904_v1, 0  ;;  %v389_v4 = vsel %vm299_vm0, %v905_v3, 0  ;;  %v392_v6 = vsel %vm299_vm0, %v906_v5, 0  ;;  %v907_v7 = vld [vmem:[%s1015_s19 + $0x18] sm:$0xff]   ;;  %v908_v9 = vld [vmem:[%s1015_s19 + $0x20] sm:$0xff]   ;;  %v909_v11 = vld [vmem:[%s1015_s19 + $0x28] sm:$0xff]  }
  0x13   : > { %835 = vmatpush3.bf16.xpose.msra.mxu0 %v386_v2  ;;  %v395_v8 = vsel %vm299_vm0, %v907_v7, 0  ;;  %v398_v10 = vsel %vm299_vm0, %v908_v9, 0  ;;  %v401_v12 = vsel %vm299_vm0, %v909_v11, 0  ;;  %v910_v13 = vld [vmem:[%s1015_s19 + $0x30] sm:$0xff]   ;;  %v911_v15 = vld [vmem:[%s1015_s19 + $0x38] sm:$0xff]   ;;  %v912_v17 = vld [vmem:[%s257_s23] sm:$0xff]  }
  0x14   : > { %836 = vmatprep.subr.bf16.mxu0 %v957_v0  ;;  %v404_v14 = vsel %vm299_vm0, %v910_v13, 0  ;;  %v407_v16 = vsel %vm299_vm0, %v911_v15, 0  ;;  %v913_v28 = vld [vmem:[%s1058_s26] sm:$0xff]   ;;  %v914_v29 = vld [vmem:[%s1058_s26 + $0x8] sm:$0xff]   ;;  %v915_v30 = vld [vmem:[%s1058_s26 + $0x10] sm:$0xff]  }
  0x15   : > { %855 = vmatpush3.bf16.msra.mxu1 %v913_v28  ;;  %v916_v36 = vld [vmem:[%s1058_s26 + $0x18] sm:$0xff]   ;;  %v917_v40 = vld [vmem:[%s1058_s26 + $0x20] sm:$0xff]   ;;  %v918_v41 = vld [vmem:[%s1058_s26 + $0x28] sm:$0xff]  }
  0x16   : > { %856 = vmatprep.subr.bf16.mxu1 %v957_v0  ;;  %v919_v42 = vld [vmem:[%s1058_s26 + $0x30] sm:$0xff]   ;;  %v920_v43 = vld [vmem:[%s1058_s26 + $0x38] sm:$0xff]   ;;  %v501_v11 = vld [vmem:[#allocation4] sm:$0xff] }
  0x17   : > { %v502_v13 = vld [vmem:[#allocation4 + $0x8] sm:$0xff] }
  0x19   : > { %857 = vmatpush3.bf16.msra.mxu1 %v914_v29 }
  0x1a   : > { %858 = vmatprep.subr.bf16.mxu1 %v957_v0 }
  0x1b   : > { %837 = vmatpush3.bf16.xpose.msra.mxu0 %v389_v4 }
  0x1c   : > { %838 = vmatprep.subr.bf16.mxu0 %v957_v0 }
  0x1d   : > { %859 = vmatpush3.bf16.msra.mxu1 %v915_v30 }
  0x1e   : > { %860 = vmatprep.subr.bf16.mxu1 %v957_v0 }
  0x21   : > { %861 = vmatpush3.bf16.msra.mxu1 %v916_v36 }
  0x22   : > { %862 = vmatprep.subr.bf16.mxu1 %v957_v0 }
  0x23   : > { %839 = vmatpush3.bf16.xpose.msra.mxu0 %v392_v6 }
  0x24   : > { %840 = vmatprep.subr.bf16.mxu0 %v957_v0 }
  0x25   : > { %863 = vmatpush3.bf16.msra.mxu1 %v917_v40 }
  0x26   : > { %864 = vmatprep.subr.bf16.mxu1 %v957_v0 }
  0x29   : > { %865 = vmatpush3.bf16.msra.mxu1 %v918_v41 }
  0x2a   : > { %866 = vmatprep.subr.bf16.mxu1 %v957_v0 }
  0x2b   : > { %841 = vmatpush3.bf16.xpose.msra.mxu0 %v395_v8 }
  0x2c   : > { %842 = vmatprep.subr.bf16.mxu0 %v957_v0 }
  0x2d   : > { %867 = vmatpush3.bf16.msra.mxu1 %v919_v42 }
  0x2e   : > { %868 = vmatprep.subr.bf16.mxu1 %v957_v0 }
  0x31   : > { %869 = vmatpush3.bf16.msra.mxu1 %v920_v43 }
  0x33   : > { %843 = vmatpush3.bf16.xpose.msra.mxu0 %v398_v10 }
  0x34   : > { %844 = vmatprep.subr.bf16.mxu0 %v957_v0 }
  0x3b   : > { %845 = vmatpush3.bf16.xpose.msra.mxu0 %v401_v12 }
  0x3c   : > { %846 = vmatprep.subr.bf16.mxu0 %v957_v0 }
  0x43   : > { %847 = vmatpush3.bf16.xpose.msra.mxu0 %v404_v14 }
  0x44   : > { %848 = vmatprep.subr.bf16.mxu0 %v957_v0 }
  0x4b   : > { %849 = vmatpush3.bf16.xpose.msra.mxu0 %v407_v16 }
  0x52   : > { %851 = vmatmul.mubr.msk.bf16.vlgmr.msra.gmra.mrb[0].mxu0 %vm299_vm0, %v912_v17 }
 0x125   : > { %v443_v21 = vpop.f32.mrb[0].mxu0 }
 0x126   : > { %v852_v22 = vpop.f32.mrb[1].mxu0  ;;  %v456_v23 = vsel %vm455_vm3, %v443_v21, -1e+30 }
 0x127   : > { %460 = vmax.xlane.f32.xlu0 %v456_v23  ;;  %v446_v24 = vpop.f32.mrb[2].mxu0 }
 0x128   : > { %v853_v25 = vpop.f32.mrb[3].mxu0  ;;  %v457_v26 = vsel %vm455_vm3, %v446_v24, -1e+30 }
 0x12b   : > { %462 = vmax.xlane.f32.xlu0 %v457_v26 }
 0x1b4   : > { %v461_v32 = vpop.xlane.xlu0 %460 }
 0x1b5   : > { %v464_v33 = vmax.f32 %v458_v31, %v461_v32 }
 0x1b7   : > { %v466_v35 = vsub.f32 %v458_v31, %v464_v33  ;;  %609 = vst.msk [vmem:[#allocation2] sm:$0xff] %vm294_vm2, %v464_v33  ;;  %474 = vperm.xlu1 %902, %v464_v33  }
 0x1b8   : > { %v463_v37 = vpop.xlane.xlu0 %462 }
 0x1b9   : > { %v465_v38 = vmax.f32 %v459_v34, %v463_v37  ;;  %v468_v54 = vmul.f32 1.442695, %v466_v35 }
 0x1bb   : > { %v467_v39 = vsub.f32 %v459_v34, %v465_v38  ;;  %610 = vst.msk [vmem:[#allocation2 + $0x8] sm:$0xff] %vm294_vm2, %v465_v38  ;;  %479 = vperm.xlu1 %902, %v465_v38  }
 0x1bd   : > { %v470_v53 = vmul.f32 1.442695, %v467_v39 }
 0x236   : > { %v475_v44 = vpop.permute.xlu1 %474 }
 0x237   : > { %v482_v45 = vsub.f32 %v456_v23, %v475_v44 }
 0x239   : > { %v484_v46 = vmul.f32 1.442695, %v482_v45 }
 0x23a   : > { %v480_v47 = vpop.permute.xlu1 %479 }
 0x23b   : > { %921 = vpow2.f32 %v484_v46  ;;  %v483_v48 = vsub.f32 %v457_v26, %v480_v47 }
 0x23d   : > { %v486_v49 = vmul.f32 1.442695, %v483_v48 }
 0x23f   : > { %923 = vpow2.f32 %v486_v49 }
 0x240   : > { %925 = vpow2.f32 %v470_v53 }
 0x241   : > { %927 = vpow2.f32 %v468_v54 }
 0x245   : > { %v922_v50 = vpop.eup %921 }
 0x246   : > { %492 = vadd.xlane.f32.xlu0 %v922_v50 }
 0x249   : > { %v924_v51 = vpop.eup %923 }
 0x24a   : > { %494 = vadd.xlane.f32.xlu1 %v924_v51  ;;  %v515_v52 = vpack.c.bf16 %v924_v51, %v922_v50  ;;  %v926_v55 = vpop.eup %925 }
 0x24b   : > { %v928_v56 = vpop.eup %927  ;;  %v491_v62 = vmul.f32 %v926_v55, %v489_v60 }
 0x24c   : > { %871 = vmatmul.mubr.bf16.vlgmr.msra.gmra.mrb[0].mxu1 %v515_v52  ;;  %v490_v58 = vmul.f32 %v928_v56, %v488_v57 }
 0x25b   : > { %510 = vperm.xlu1 %902, %v926_v55  }
 0x25c   : > { %505 = vperm.xlu0 %903, %v928_v56  }
 0x2d3   : > { %v493_v59 = vpop.xlane.xlu0 %492 }
 0x2d4   : > { %v496_v61 = vadd.f32 %v493_v59, %v490_v58 }
 0x2d6   : > { %499 = vst.msk [vmem:[#allocation3] sm:$0xff] %vm294_vm2, %v496_v61 }
 0x2d7   : > { %v495_v63 = vpop.xlane.xlu1 %494 }
 0x2d8   : > { %v497_v0 = vadd.f32 %v495_v63, %v491_v62 }
 0x2da   : > { %500 = vst.msk [vmem:[#allocation3 + $0x8] sm:$0xff] %vm294_vm2, %v497_v0 }
 0x2db   : > { %v506_v12 = vpop.permute.xlu0 %505  ;;  %v511_v14 = vpop.permute.xlu1 %510 }
 0x2dc   : > { %v513_v15 = vmul.f32 %v506_v12, %v501_v11  ;;  %v514_v17 = vmul.f32 %v511_v14, %v502_v13 }
 0x2dd   : > { %v614_v1 = vld [vmem:[#allocation3] sm:$0xff] }
 0x2de   : > { %929 = vrcp.f32 %v614_v1 }
 0x2e1   : > { %v615_v2 = vld [vmem:[#allocation3 + $0x8] sm:$0xff] }
 0x2e2   : > { %931 = vrcp.f32 %v615_v2 }
 0x2e8   : > { %v930_v3 = vpop.eup %929 }
 0x2e9   : > { %v618_v4 = vmul.f32 %v930_v3, %v614_v1 }
 0x2eb   : > { %v620_v5 = vsub.f32 2.0, %v618_v4 }
 0x2ec   : > { %v932_v6 = vpop.eup %931 }
 0x2ed   : > { %v622_v7 = vmul.f32 %v930_v3, %v620_v5  ;;  %v619_v8 = vmul.f32 %v932_v6, %v615_v2 }
 0x2ef   : > { %628 = vperm.xlu0 %903, %v622_v7   ;;  %v621_v9 = vsub.f32 2.0, %v619_v8 }
 0x2f1   : > { %v623_v10 = vmul.f32 %v932_v6, %v621_v9 }
 0x2f3   : > { %633 = vperm.xlu0 %903, %v623_v10  }
 0x31f   : > { %v598_v16 = vpop.f32.mrb[0].mxu1 }
 0x320   : > { %v605_v18 = vadd.f32 %v598_v16, %v513_v15  ;;  %v872_v19 = vpop.f32.mrb[1].mxu1 }
 0x321   : > { %v601_v20 = vpop.f32.mrb[2].mxu1 }
 0x322   : > { %607 = vst.msk [vmem:[#allocation4] sm:$0xff] %vm299_vm0, %v605_v18  ;;  %v606_v21 = vadd.f32 %v601_v20, %v514_v17  ;;  %v873_v22 = vpop.f32.mrb[3].mxu1 }
 0x324   : > { %608 = vst.msk [vmem:[#allocation4 + $0x8] sm:$0xff] %vm299_vm0, %v606_v21 }
 0x329   : > { %v624_v23 = vld [vmem:[#allocation4] sm:$0xff] }
 0x32b   : > { %v625_v27 = vld [vmem:[#allocation4 + $0x8] sm:$0xff] }
 0x36e   : > { %v629_v24 = vpop.permute.xlu0 %628 }
 0x36f   : > { %v636_v25 = vmul.f32 %v629_v24, %v624_v23 }
 0x371   : > { %v814_v26 = vpack.c.bf16 %v636_v25, %v636_v25 }
 0x372   : > { %v634_v28 = vpop.permute.xlu0 %633 }
 0x373   : > { %647 = vst.msk [vmem:[%s287_s29] sm:$0xf] %vm646_vm4, %v814_v26  ;;  %v637_v29 = vmul.f32 %v634_v28, %v625_v27 }
 0x375   : > { %v815_v30 = vpack.c.bf16 %v637_v29, %v637_v29 }
 0x377   : > { %648 = vst.msk [vmem:[%s287_s29 + $0x4] sm:$0xf] %vm646_vm4, %v815_v30 }
 0x378 PF: > { %s13_s14 = sadd.s32 1, %s955_s14   ;;  %s1099_s12 = smov %s951_s13 }
 0x379   : > { %p10_p5 = scmp.ge.s32.totalorder %s13_s14, 10   ;;  %s1100_s13 = smov %s1102_s15 }
 0x37b   :  { %12 = sbr.rel (!%p10_p5) target bundleno = 2 (0x2), region = 76 }

</bundles_post_ra>
